<compile_context>
chip_gen: v6e
topology: v6e:2x2x1
jax: 0.10.0
libtpu: 0.0.40
codegen_flags: <defaults>
</compile_context>

<pallas_src>
import functools
import math

import jax
import jax.numpy as jnp
from jax import lax
from jax.experimental import pallas as pl
from jax.experimental.pallas import tpu as pltpu


NEG_INF = -1e30  # finite mask value: no exp(-inf - -inf) NaN hazard


def _proj_kernel(x_ref, wq_ref, wk_ref, wv_ref, q_ref, k_ref, v_ref, *, scale):
    """Project one (tm, C) row-tile of x into q/k/v (tm, Hp) bf16 tiles.

    The 1/sqrt(C) score scale (PyTorch module divides by n_embd**0.5) is
    folded into q here, once per row, instead of once per score element.
    """
    x = x_ref[...]                                              # (tm, C) bf16
    q = jnp.dot(x, wq_ref[...], preferred_element_type=jnp.float32)
    q_ref[...] = (q * jnp.float32(scale)).astype(q_ref.dtype)
    k_ref[...] = jnp.dot(x, wk_ref[...],
                         preferred_element_type=jnp.float32).astype(k_ref.dtype)
    v_ref[...] = jnp.dot(x, wv_ref[...],
                         preferred_element_type=jnp.float32).astype(v_ref.dtype)


def _attn_kernel(q_ref, k_ref, v_ref, o_ref, m_sc, l_sc, acc_sc, *, tq, tkv):
    """One (batch, q-tile, kv-tile) step of causal online-softmax attention."""
    qi = pl.program_id(1)
    ki = pl.program_id(2)
    q_start = qi * tq
    k_start = ki * tkv

    @pl.when(ki == 0)
    def _init():
        m_sc[...] = jnp.full_like(m_sc, NEG_INF)
        l_sc[...] = jnp.zeros_like(l_sc)
        acc_sc[...] = jnp.zeros_like(acc_sc)

    # Exploit causality: skip KV tiles that are entirely in the future.
    @pl.when(k_start <= q_start + (tq - 1))
    def _step():
        # Scores: contract the last dims (no explicit k.T relayout / XLU).
        s = lax.dot_general(
            q_ref[...], k_ref[...],
            dimension_numbers=(((1,), (1,)), ((), ())),
            preferred_element_type=jnp.float32)                 # (tq, tkv)

        # Causal mask for (at most) the diagonal tile; also hides any
        # zero-padded key rows past the true sequence end.
        row = q_start + lax.broadcasted_iota(jnp.int32, (tq, tkv), 0)
        col = k_start + lax.broadcasted_iota(jnp.int32, (tq, tkv), 1)
        s = jnp.where(col <= row, s, jnp.float32(NEG_INF))

        # Online (flash) softmax update, f32 accumulation.
        m_prev = m_sc[...]
        m_new = jnp.maximum(m_prev, jnp.max(s, axis=-1, keepdims=True))
        alpha = jnp.exp(m_prev - m_new)
        p = jnp.exp(s - m_new)
        l_sc[...] = alpha * l_sc[...] + jnp.sum(p, axis=-1, keepdims=True)
        acc_sc[...] = alpha * acc_sc[...] + jnp.dot(
            p.astype(jnp.bfloat16), v_ref[...],
            preferred_element_type=jnp.float32)
        m_sc[...] = m_new

    # TODO(synk): dropout on the attention weights is identity here (eval /
    # p=0); training-mode dropout would use pltpu.prng_seed + prng_random_bits
    # on p inside _step.

    @pl.when(ki == pl.num_programs(2) - 1)
    def _finalize():
        inv_l = pl.reciprocal(l_sc[...], approx=True)           # EUP slot
        o_ref[...] = (acc_sc[...] * inv_l).astype(o_ref.dtype)


def head_forward(x, wk, wq, wv):
    """x: (B, T, C); wk/wq/wv: (C, H). Returns (B, T, H) in x.dtype."""
    B, T, C = x.shape
    H = wk.shape[1]
    out_dtype = x.dtype

    # Lane-dense head dim: zero-padded columns are inert in QK^T and give
    # zero output columns, sliced off below.
    # TODO(synk): when H << 128 the right fix is fusing several real heads per
    # call; the module interface is a single head, so padding is accepted here.
    Hp = max(128, ((H + 127) // 128) * 128)
    if Hp != H:
        pad = ((0, 0), (0, Hp - H))
        wk = jnp.pad(wk, pad)
        wq = jnp.pad(wq, pad)
        wv = jnp.pad(wv, pad)

    # Tile sizes: whole sequence when small; 256 otherwise (fills the 256-wide
    # MXU on v6e/v7x and amortizes per-grid-step overhead).  The sequence is
    # zero-padded to a multiple of the tile so there is never an irregular
    # whole-sequence fallback tile.
    if T <= 256:
        tq = tkv = T
    else:
        tq = tkv = 256
    Tp = pl.cdiv(T, tq) * tq
    if Tp != T:
        x = jnp.pad(x, ((0, 0), (0, Tp - T), (0, 0)))
    n_q = Tp // tq
    n_kv = Tp // tkv

    xb = x.astype(jnp.bfloat16)
    wqb = wq.astype(jnp.bfloat16)
    wkb = wk.astype(jnp.bfloat16)
    wvb = wv.astype(jnp.bfloat16)

    scale = 1.0 / math.sqrt(C)
    vmem_limit = 32 * 1024 * 1024  # explicit, safe on v5e/v6e/v7x

    # ---- Kernel 1: q/k/v projections (computed once, bf16, Hp-padded) ----
    proj_cost = pl.CostEstimate(
        flops=B * Tp * 6 * C * Hp,
        transcendentals=0,
        bytes_accessed=B * Tp * C * 2 + 3 * C * Hp * 2 + 3 * B * Tp * Hp * 2)
    q, k, v = pl.pallas_call(
        functools.partial(_proj_kernel, scale=scale),
        out_shape=(
            jax.ShapeDtypeStruct((B, Tp, Hp), jnp.bfloat16),
            jax.ShapeDtypeStruct((B, Tp, Hp), jnp.bfloat16),
            jax.ShapeDtypeStruct((B, Tp, Hp), jnp.bfloat16),
        ),
        grid_spec=pltpu.PrefetchScalarGridSpec(
            num_scalar_prefetch=0,
            grid=(B, n_q),
            in_specs=[
                pl.BlockSpec((None, tq, C), lambda b, i: (b, i, 0)),
                pl.BlockSpec((C, Hp), lambda b, i: (0, 0)),
                pl.BlockSpec((C, Hp), lambda b, i: (0, 0)),
                pl.BlockSpec((C, Hp), lambda b, i: (0, 0)),
            ],
            out_specs=[
                pl.BlockSpec((None, tq, Hp), lambda b, i: (b, i, 0)),
                pl.BlockSpec((None, tq, Hp), lambda b, i: (b, i, 0)),
                pl.BlockSpec((None, tq, Hp), lambda b, i: (b, i, 0)),
            ],
        ),
        compiler_params=pltpu.CompilerParams(
            dimension_semantics=("parallel", "parallel"),
            vmem_limit_bytes=vmem_limit),
        cost_estimate=proj_cost,
    )(xb, wqb, wkb, wvb)

    # ---- Kernel 2: causal flash attention over KV tiles ----
    attn_cost = pl.CostEstimate(
        flops=B * 2 * Tp * Tp * Hp,            # ~causal half of 4*T^2*Hp
        transcendentals=B * Tp * Tp // 2,
        bytes_accessed=3 * B * Tp * Hp * 2 + B * Tp * Hp * 2)
    out = pl.pallas_call(
        functools.partial(_attn_kernel, tq=tq, tkv=tkv),
        out_shape=jax.ShapeDtypeStruct((B, Tp, Hp), jnp.bfloat16),
        grid_spec=pltpu.PrefetchScalarGridSpec(
            num_scalar_prefetch=0,
            grid=(B, n_q, n_kv),
            in_specs=[
                pl.BlockSpec((None, tq, Hp), lambda b, qi, ki: (b, qi, 0)),
                pl.BlockSpec((None, tkv, Hp), lambda b, qi, ki: (b, ki, 0)),
                pl.BlockSpec((None, tkv, Hp), lambda b, qi, ki: (b, ki, 0)),
            ],
            out_specs=pl.BlockSpec((None, tq, Hp),
                                   lambda b, qi, ki: (b, qi, 0)),
            scratch_shapes=[
                pltpu.VMEM((tq, 1), jnp.float32),    # running max m
                pltpu.VMEM((tq, 1), jnp.float32),    # running denom l
                pltpu.VMEM((tq, Hp), jnp.float32),   # f32 accumulator
            ],
        ),
        compiler_params=pltpu.CompilerParams(
            dimension_semantics=("parallel", "parallel", "arbitrary"),
            vmem_limit_bytes=vmem_limit),
        cost_estimate=attn_cost,
    )(q, k, v)

    # Slice padded rows / head lanes off outside the kernel; restore dtype.
    return out[:, :T, :H].astype(out_dtype)


def head_reference(x, wk, wq, wv):
    """Pure-JAX f32 reference mirroring the PyTorch forward (eval mode)."""
    B, T, C = x.shape
    k = x @ wk
    q = x @ wq
    v = x @ wv
    wei = jnp.einsum("btd,bsd->bts", q, k) / (C ** 0.5)
    tril = jnp.tril(jnp.ones((T, T), dtype=bool))
    wei = jnp.where(tril, wei, -jnp.inf)
    wei = jax.nn.softmax(wei, axis=-1)
    return wei @ v


if __name__ == "__main__":
    # Small config consistent with the module: block_size >= T.
    B, T, C, HEAD = 2, 8, 32, 16   # batch, seq, n_embd, head_size

    key = jax.random.PRNGKey(0)
    kx, kk, kq, kv = jax.random.split(key, 4)

    x = jax.random.normal(kx, (B, T, C), dtype=jnp.float32)
    # Deterministic "Linear(n_embd, head_size, bias=False)" weights, stored (C, H).
    s = 1.0 / math.sqrt(C)
    wk = jax.random.uniform(kk, (C, HEAD), jnp.float32, -s, s)
    wq = jax.random.uniform(kq, (C, HEAD), jnp.float32, -s, s)
    wv = jax.random.uniform(kv, (C, HEAD), jnp.float32, -s, s)

    out = jax.block_until_ready(head_forward(x, wk, wq, wv))
    ref = head_reference(x, wk, wq, wv)

    assert out.shape == (B, T, HEAD)
    # bf16 matmul operands / bf16 output + approx reciprocal -> loose tolerance.
    assert jnp.allclose(out, ref, atol=3e-2, rtol=3e-2), "mismatch vs reference"

    print("KERNEL_OK")
</pallas_src>

<mosaic_0001>
module attributes {stable_mosaic.version = 11 : i64} {
  func.func @_proj_kernel(%arg0: i32, %arg1: i32, %arg2: memref<1x8x32xbf16, #tpu.memory_space<vmem>>, %arg3: memref<32x128xbf16, #tpu.memory_space<vmem>>, %arg4: memref<32x128xbf16, #tpu.memory_space<vmem>>, %arg5: memref<32x128xbf16, #tpu.memory_space<vmem>>, %arg6: memref<1x8x128xbf16, #tpu.memory_space<vmem>>, %arg7: memref<1x8x128xbf16, #tpu.memory_space<vmem>>, %arg8: memref<1x8x128xbf16, #tpu.memory_space<vmem>>) attributes {dimension_semantics = [#tpu.dimension_semantics<parallel>, #tpu.dimension_semantics<parallel>], iteration_bounds = array<i64: 2, 1>, scalar_prefetch = 0 : i64, scratch_operands = 0 : i64, tpu.core_type = #tpu.core_type<tc>, window_params = [{transform_indices = @transform_0, window_bounds = array<i64: 1, 8, 32>}, {pipeline_mode = #tpu.pipeline_mode<synchronous>, transform_indices = @transform_1, window_bounds = array<i64: 32, 128>}, {pipeline_mode = #tpu.pipeline_mode<synchronous>, transform_indices = @transform_2, window_bounds = array<i64: 32, 128>}, {pipeline_mode = #tpu.pipeline_mode<synchronous>, transform_indices = @transform_3, window_bounds = array<i64: 32, 128>}, {transform_indices = @transform_4, window_bounds = array<i64: 1, 8, 128>}, {transform_indices = @transform_5, window_bounds = array<i64: 1, 8, 128>}, {transform_indices = @transform_6, window_bounds = array<i64: 1, 8, 128>}]} {
    %c0 = arith.constant 0 : index
    %c0_0 = arith.constant 0 : index
    %c0_1 = arith.constant 0 : index
    %0 = vector.load %arg2[%c0, %c0_0, %c0_1] : memref<1x8x32xbf16, #tpu.memory_space<vmem>>, vector<1x8x32xbf16>
    %1 = vector.shape_cast %0 : vector<1x8x32xbf16> to vector<8x32xbf16>
    %c0_2 = arith.constant 0 : index
    %c0_3 = arith.constant 0 : index
    %2 = vector.load %arg3[%c0_2, %c0_3] : memref<32x128xbf16, #tpu.memory_space<vmem>>, vector<32x128xbf16>
    %cst = arith.constant dense<0.000000e+00> : vector<8x128xf32>
    %3 = tpu.matmul %1, %2, %cst {dimension_numbers = #tpu.dot_dimension_numbers<[1], [0], [0], [1], [0, 0, 1, 1], [], []>} : vector<8x32xbf16>, vector<32x128xbf16>, vector<8x128xf32> -> vector<8x128xf32>
    %cst_4 = arith.constant 0.176776692 : f32
    %4 = vector.broadcast %cst_4 : f32 to vector<8x128xf32>
    %5 = arith.mulf %3, %4 : vector<8x128xf32>
    %6 = arith.truncf %5 : vector<8x128xf32> to vector<8x128xbf16>
    %c0_5 = arith.constant 0 : index
    %c0_6 = arith.constant 0 : index
    %c0_7 = arith.constant 0 : index
    %7 = vector.load %arg6[%c0_5, %c0_6, %c0_7] : memref<1x8x128xbf16, #tpu.memory_space<vmem>>, vector<1x8x128xbf16>
    %8 = vector.shape_cast %7 : vector<1x8x128xbf16> to vector<8x128xbf16>
    %9 = vector.shape_cast %6 : vector<8x128xbf16> to vector<1x8x128xbf16>
    tpu.vector_store %arg6[%c0_5, %c0_6, %c0_7], %9 {strides = array<i32>} : memref<1x8x128xbf16, #tpu.memory_space<vmem>>, vector<1x8x128xbf16>,
    %c0_8 = arith.constant 0 : index
    %c0_9 = arith.constant 0 : index
    %10 = vector.load %arg4[%c0_8, %c0_9] : memref<32x128xbf16, #tpu.memory_space<vmem>>, vector<32x128xbf16>
    %cst_10 = arith.constant dense<0.000000e+00> : vector<8x128xf32>
    %11 = tpu.matmul %1, %10, %cst_10 {dimension_numbers = #tpu.dot_dimension_numbers<[1], [0], [0], [1], [0, 0, 1, 1], [], []>} : vector<8x32xbf16>, vector<32x128xbf16>, vector<8x128xf32> -> vector<8x128xf32>
    %12 = arith.truncf %11 : vector<8x128xf32> to vector<8x128xbf16>
    %c0_11 = arith.constant 0 : index
    %c0_12 = arith.constant 0 : index
    %c0_13 = arith.constant 0 : index
    %13 = vector.load %arg7[%c0_11, %c0_12, %c0_13] : memref<1x8x128xbf16, #tpu.memory_space<vmem>>, vector<1x8x128xbf16>
    %14 = vector.shape_cast %13 : vector<1x8x128xbf16> to vector<8x128xbf16>
    %15 = vector.shape_cast %12 : vector<8x128xbf16> to vector<1x8x128xbf16>
    tpu.vector_store %arg7[%c0_11, %c0_12, %c0_13], %15 {strides = array<i32>} : memref<1x8x128xbf16, #tpu.memory_space<vmem>>, vector<1x8x128xbf16>,
    %c0_14 = arith.constant 0 : index
    %c0_15 = arith.constant 0 : index
    %16 = vector.load %arg5[%c0_14, %c0_15] : memref<32x128xbf16, #tpu.memory_space<vmem>>, vector<32x128xbf16>
    %cst_16 = arith.constant dense<0.000000e+00> : vector<8x128xf32>
    %17 = tpu.matmul %1, %16, %cst_16 {dimension_numbers = #tpu.dot_dimension_numbers<[1], [0], [0], [1], [0, 0, 1, 1], [], []>} : vector<8x32xbf16>, vector<32x128xbf16>, vector<8x128xf32> -> vector<8x128xf32>
    %18 = arith.truncf %17 : vector<8x128xf32> to vector<8x128xbf16>
    %c0_17 = arith.constant 0 : index
    %c0_18 = arith.constant 0 : index
    %c0_19 = arith.constant 0 : index
    %19 = vector.load %arg8[%c0_17, %c0_18, %c0_19] : memref<1x8x128xbf16, #tpu.memory_space<vmem>>, vector<1x8x128xbf16>
    %20 = vector.shape_cast %19 : vector<1x8x128xbf16> to vector<8x128xbf16>
    %21 = vector.shape_cast %18 : vector<8x128xbf16> to vector<1x8x128xbf16>
    tpu.vector_store %arg8[%c0_17, %c0_18, %c0_19], %21 {strides = array<i32>} : memref<1x8x128xbf16, #tpu.memory_space<vmem>>, vector<1x8x128xbf16>,
    return
  }
  func.func @transform_0(%arg0: i32, %arg1: i32) -> (i32, i32, i32) {
    %c0_i32 = arith.constant 0 : i32
    %c0_i32_0 = arith.constant 0 : i32
    return %arg0, %arg1, %c0_i32 : i32, i32, i32
  }
  func.func @transform_1(%arg0: i32, %arg1: i32) -> (i32, i32) {
    %c0_i32 = arith.constant 0 : i32
    %c0_i32_0 = arith.constant 0 : i32
    %c0_i32_1 = arith.constant 0 : i32
    return %c0_i32, %c0_i32_0 : i32, i32
  }
  func.func @transform_2(%arg0: i32, %arg1: i32) -> (i32, i32) {
    %c0_i32 = arith.constant 0 : i32
    %c0_i32_0 = arith.constant 0 : i32
    %c0_i32_1 = arith.constant 0 : i32
    return %c0_i32, %c0_i32_0 : i32, i32
  }
  func.func @transform_3(%arg0: i32, %arg1: i32) -> (i32, i32) {
    %c0_i32 = arith.constant 0 : i32
    %c0_i32_0 = arith.constant 0 : i32
    %c0_i32_1 = arith.constant 0 : i32
    return %c0_i32, %c0_i32_0 : i32, i32
  }
  func.func @transform_4(%arg0: i32, %arg1: i32) -> (i32, i32, i32) {
    %c0_i32 = arith.constant 0 : i32
    %c0_i32_0 = arith.constant 0 : i32
    return %arg0, %arg1, %c0_i32 : i32, i32, i32
  }
  func.func @transform_5(%arg0: i32, %arg1: i32) -> (i32, i32, i32) {
    %c0_i32 = arith.constant 0 : i32
    %c0_i32_0 = arith.constant 0 : i32
    return %arg0, %arg1, %c0_i32 : i32, i32, i32
  }
  func.func @transform_6(%arg0: i32, %arg1: i32) -> (i32, i32, i32) {
    %c0_i32 = arith.constant 0 : i32
    %c0_i32_0 = arith.constant 0 : i32
    return %arg0, %arg1, %c0_i32 : i32, i32, i32
  }
}

</mosaic_0001>

<bundles_post_ra>
// kernel: tpu_custom_call.1
= control target key start
LH: loop header
LB: loop body
LE: loop exit
PB: predicated region body
PF: predicated region fallthrough
CT: control target
= control target key end

     0   :  { %s1506_s0 = inlined_call_operand.hbm [shape: bf16[2,8,32], index: 0, kind: input, shape index: {}]   ;;  %s1507_s1 = inlined_call_operand.hbm [shape: bf16[32,128], index: 1, kind: input, shape index: {}]   ;;  %s1508_s2 = inlined_call_operand.hbm [shape: bf16[32,128], index: 2, kind: input, shape index: {}]   ;;  %s1509_s3 = inlined_call_operand.hbm [shape: bf16[32,128], index: 3, kind: input, shape index: {}]   ;;  %s1510_s4 = inlined_call_operand.hbm [shape: bf16[2,8,128], index: 4, kind: output, shape index: {0}]   ;;  %s1511_s5 = inlined_call_operand.hbm [shape: bf16[2,8,128], index: 5, kind: output, shape index: {1}]   ;;  %s1512_s6 = inlined_call_operand.hbm [shape: bf16[2,8,128], index: 6, kind: output, shape index: {2}]  }
   0x1   :  { %1517 = sst [smem:[#allocation19_spill]] %s1506_s0 }
   0x2   :  { %1518 = sst [smem:[#allocation20_spill]] %s1507_s1 }
   0x3   :  { %1519 = sst [smem:[#allocation21_spill]] %s1508_s2 }
   0x4   :  { %12 = vsyncpa [#allocation3], 0 }
   0x5   :  { %14 = vsyncpa [#allocation3 + $0x1], 0 }
   0x6   :  { %15 = vsyncpa [#allocation6], 0 }
   0x7   :  { %16 = vsyncpa [#allocation9], 0 }
   0x8   :  { %17 = vsyncpa [#allocation4], 0 }
   0x9   :  { %19 = vsyncpa [#allocation4 + $0x1], 0 }
   0xa   :  { %20 = vsyncpa [#allocation12], 0 }
   0xb   :  { %22 = vsyncpa [#allocation12 + $0x1], 0  ;;  %s1234_s21 = smov 0   ;;  %s1236_s22 = smov 0  }
   0xc   :  { %s1238_s23 = smov 0   ;;  %s1240_s24 = smov 0  }
   0xd   :  { %s1242_s25 = smov 0   ;;  %s1244_s26 = smov 0  }
   0xe LB: > { %s1265_s27 = sadd.s32 4294967295, %s1186_s26   ;;  %s1515_s28 = sadd.s32 4294967294, %s1186_s26   ;;  %s1186_s26 = sphi %s1244_s26, %s28_s26   ;;  %s1182_s25 = sphi %s1242_s25, %s1543_s25   ;;  %s1178_s24 = sphi %s1240_s24, %s1542_s24   ;;  %s1174_s23 = sphi %s1238_s23, %s1541_s23   ;;  %s1170_s22 = sphi %s1236_s22, %s1540_s22   ;;  %s1166_s21 = sphi %s1234_s21, %s1539_s21  }
   0xf   : > { %p62_p0 = scmp.ne.s32.totalorder %s1170_s22, %s1166_s21  ;;  %p1513_p1 = scmp.eq.s32.totalorder %s1265_s27, 0 }
  0x10   : > { %p157_p3 = scmp.eq.s32.totalorder %s1515_s28, 1  ;;  %p758_p5 = scmp.ge.s32.totalorder %s1186_s26, 1 }
  0x11   : > { %p1276_p4 = por %p1513_p1, %p62_p0  ;;  %p220_p7 = scmp.lt.s32.totalorder %s1186_s26, 3 }
  0x12   : > { %p1281_p6 = por %p157_p3, %p62_p0  ;;  %s1188_s8 = smov [#allocation5]  }
  0x13   : > { %s1520_s29 = scalar_select %p1276_p4, 1, 0 }
  0x14   : > { %s1521_s30 = scalar_select %p1281_p6, 1, 0 }
  0x15   : > { %p1286_p8 = pnand %p758_p5, %p220_p7  ;;  %s232_s9 = sshll.u32 %s1188_s8, 4  ;;  %s233_s9 = int_to_ptr.vmem [resolvable:$true] %s232_s9 }
  0x16   : > { %s1189_s11 = smov [#allocation7]   ;;  %s1190_s13 = smov [#allocation8]  }
  0x17   : > { %p843_p9 = pneg %p1286_p8  ;;  %s245_s12 = sshll.u32 %s1189_s11, 4  ;;  %s246_s12 = int_to_ptr.vmem [resolvable:$true] %s245_s12 }
  0x18   : > { %s258_s14 = sshll.u32 %s1190_s13, 4  ;;  %s947_s15 = scalar_lea.vmem %s233_s9, 256  ;;  %s259_s14 = int_to_ptr.vmem [resolvable:$true] %s258_s14 }
  0x19   : > { %p1295_p11 = pnand %p843_p9, %p1513_p1  ;;  %p948_p13 = scmp.ne.s32.totalorder %s233_s9, %s947_s15 }
  0x1a   : > { %p955_p5 = scmp.lt.s32.totalorder %s233_s9, %s233_s9  ;;  %p956_p7 = scmp.lt.s32.totalorder %s947_s15, %s947_s15 }
  0x1b   : > { %p938_p12 = pneg %p1295_p11 }
  0x1c   : > { %p957_p9 = por %p956_p7, %p955_p5 }
  0x1d   : > { %p950_p0 = pnand %p948_p13, %p938_p12 }
  0x1f   : > { %p951_p3 = pneg %p950_p0 }
  0x21   : > { %p958_p10 = pnand %p957_p9, %p951_p3 }
  0x23   : > { %961 = shalt.err (!%p958_p10)
}
  0x24   : > { %s1191_s16 = smov 64   ;;  %s1192_s17 = smov 4  }
  0x25   : > { %s1524_s1 = sld [smem:[#allocation20_spill]]  ;;  %s973_s20 = scalar_lea.vmem %s246_s12, 256 }
  0x26   : > { %p974_p1 = scmp.ne.s32.totalorder %s246_s12, %s973_s20  ;;  %p981_p2 = scmp.lt.s32.totalorder %s246_s12, %s246_s12 }
  0x27   : > { %p982_p6 = scmp.lt.s32.totalorder %s973_s20, %s973_s20 }
  0x28   : > { %p976_p13 = pnand %p974_p1, %p938_p12 }
  0x29   : > { %p983_p5 = por %p982_p6, %p981_p2 }
  0x2a   : > { %p977_p0 = pneg %p976_p13 }
  0x2b   : > { %846 = dma.hbm_to_vmem [thread:$0]  (!%p1295_p11), %s1524_s1, 256, %s233_s9, [#allocation6], %s1191_s16, %s1191_s16, %s1192_s17  }
  0x2c   : > { %p984_p3 = pnand %p983_p5, %p977_p0 }
  0x2e   : > { %987 = shalt.err (!%p984_p3)
}
  0x2f   : > { %s1525_s2 = sld [smem:[#allocation21_spill]]  ;;  %s999_s9 = scalar_lea.vmem %s259_s14, 256 }
  0x30   : > { %p1000_p10 = scmp.ne.s32.totalorder %s259_s14, %s999_s9  ;;  %p1007_p9 = scmp.lt.s32.totalorder %s259_s14, %s259_s14 }
  0x31   : > { %p1008_p13 = scmp.lt.s32.totalorder %s999_s9, %s999_s9 }
  0x32   : > { %p1002_p7 = pnand %p1000_p10, %p938_p12 }
  0x33   : > { %p1009_p4 = por %p1008_p13, %p1007_p9 }
  0x34   : > { %p1003_p1 = pneg %p1002_p7 }
  0x35   : > { %849 = dma.hbm_to_vmem [thread:$0]  (!%p1295_p11), %s1525_s2, 256, %s246_s12, [#allocation6], %s1191_s16, %s1191_s16, %s1192_s17  }
  0x36   : > { %p1010_p2 = pnand %p1009_p4, %p1003_p1 }
  0x38   : > { %1013 = shalt.err (!%p1010_p2)
}
  0x39   : > { %852 = dma.hbm_to_vmem [thread:$0]  (!%p1295_p11), %s1509_s3, 256, %s259_s14, [#allocation9], %s1191_s16, %s1191_s16, %s1192_s17  }
  0x3a   : > { %s49_s12 = sadd.s32 1, %s1174_s23  ;;  %s40_s18 = sadd.s32 1, %s1182_s25 }
  0x3b   : > { %p56_p4 = scmp.ne.s32.totalorder %s1174_s23, %s1170_s22  ;;  %p42_p6 = scmp.ge.s32.totalorder %s40_s18, 2 }
  0x3c   : > { %p57_p12 = scmp.eq.s32.totalorder %s1186_s26, 0  ;;  %p1526_p0 = scmp.eq.s32.totalorder %s1265_s27, 1 }
  0x3d   : > { %p870_p3 = scmp.lt.s32.totalorder %s1186_s26, 2  ;;  %s1545_s18 = smov (%p42_p6, %s40_s18), 0 }
  0x3e   : > { %p1332_p5 = por %p1526_p0, %p56_p4  ;;  %p58_p10 = por %p57_p12, %p56_p4 }
  0x3f   : > { %s272_s19 = sand.u32 1, %s1174_s23   ;;  %s44_s20 = ssub.s32 %s1182_s25, %s1545_s18 }
  0x40   : > { %p47_p7 = scmp.eq.s32.totalorder %s44_s20, 0  ;;  %s763_s14 = sshll.u32 %s272_s19, 2 }
  0x41   : > { %s764_s16 = sshll.u32 %s1182_s25, 6  ;;  %s1528_s0 = sld [smem:[#allocation19_spill]] }
  0x42   : > { %s1344_s17 = scalar_select %p47_p7, %s1174_s23, %s49_s12  }
  0x43   : > { %s276_s13 = scalar_lea.vmem [#allocation2], %s763_s14  ;;  %p1351_p11 = pnand %p870_p3, %p58_p10 }
  0x44   : > { %s284_s15 = sshll.u32 %s276_s13, 4  ;;  %s273_s1 = scalar_lea.sflag [#allocation3], %s272_s19  ;;  %s285_s15 = int_to_ptr.vmem [resolvable:$true] %s284_s15 }
  0x45   : > { %p1016_p1 = pneg %p1351_p11  ;;  %s1027_s20 = scalar_lea.vmem %s285_s15, 64 }
  0x46   : > { %p1028_p9 = scmp.ne.s32.totalorder %s285_s15, %s1027_s20  ;;  %s1193_s12 = smov [#allocation2]  }
  0x47   : > { %s282_s9 = scalar_lea.hbm %s1528_s0, %s764_s16  ;;  %s1032_s2 = sshll.u32 %s1193_s12, 4  ;;  %s1033_s2 = int_to_ptr.vmem [resolvable:$false] %s1032_s2 }
  0x48   : > { %p1030_p13 = pnand %p1028_p9, %p1016_p1  ;;  %s1034_s16 = scalar_lea.vmem %s1033_s2, 128 }
  0x49   : > { %p1035_p4 = scmp.lt.s32.totalorder %s285_s15, %s1033_s2  ;;  %p1036_p6 = scmp.lt.s32.totalorder %s1034_s16, %s1027_s20 }
  0x4a   : > { %p1031_p2 = pneg %p1030_p13 }
  0x4b   : > { %p1037_p12 = por %p1036_p6, %p1035_p4 }
  0x4d   : > { %p1038_p0 = pnand %p1037_p12, %p1031_p2 }
  0x4f   : > { %1041 = shalt.err (!%p1038_p0)
}
  0x50   : > { %856 = dma.hbm_to_vmem [thread:$0]  (!%p1351_p11), %s282_s9, 64, %s285_s15, %s273_s1  }
  0x51   : > { %293 = sbr.rel (%p1286_p8) target bundleno = 358 (0x166), region = 36  ;;  %s1362_s19 = sand.u32 (!%p1286_p8), 1, %s1170_s22  }
  0x52   : > { %s1365_s14 = sshll.u32 (!%p1286_p8), %s1362_s19, 2  ;;  %s296_s2 = scalar_lea.sflag (!%p1286_p8), [#allocation3], %s1362_s19 }
  0x53   : > { %s299_s8 = scalar_lea.vmem (!%p1286_p8), [#allocation2], %s1365_s14  ;;  %p1530_p3 = scmp.ne.s32.totalorder (!%p1286_p8), %s1520_s29, 0 }
  0x56   : > { %1145 = dma.done.wait (%p1530_p3), %s296_s2, 64  }
  0x57   : > { %1147 = vsyncadd (%p1530_p3), %s296_s2, 4294967232  ;;  %p1531_p10 = scmp.eq.s32.totalorder %s1265_s27, 0 }
  0x59   : > { %1149 = dma.done.wait (%p1531_p10), [#allocation6], 512   ;;  %p1532_p8 = pmov %p1531_p10 }
  0x5b   : > { %1151 = vsyncadd (%p1532_p8), [#allocation6], 4294966784  ;;  %p1533_p7 = pmov %p1532_p8 }
  0x5d   : > { %1153 = dma.done.wait (%p1533_p7), [#allocation9], 256   ;;  %p1534_p11 = pmov %p1533_p7 }
  0x5e   : > { %v1194_v0 = vmov 0.0   ;;  %vm1195_vm0 = vmmov 0   ;;  %v930_v1 = vld [vmem:[#allocation5 + $0x8] sm:$0xff]   ;;  %v931_v2 = vld [vmem:[#allocation7 + $0x8] sm:$0xff]   ;;  %v932_v3 = vld [vmem:[#allocation5] sm:$0xff]   ;;  %vm368_vm1 = vcmask 261120  }
  0x5f   : > { %1155 = vsyncadd (%p1534_p11), [#allocation9], 4294967040  ;;  %799 = vmatprep.subr.bf16.mxu0 %v1194_v0  ;;  %807 = vmatprep.subr.bf16.mxu1 %v1194_v0  ;;  %v933_v4 = vld [vmem:[#allocation7] sm:$0xff]   ;;  %v351_v5 = vld [vmem:[%s299_s8] sm:$0xf]  ;;  %s536_s1 = sand.u32 1, %s1265_s27  }
  0x60   : > { %803 = vmatprep.mubr.msk.bf16.mxu0 %vm1195_vm0, %v1194_v0  ;;  %811 = vmatprep.mubr.msk.bf16.mxu1 %vm1195_vm0, %v1194_v0  ;;  %v934_v6 = vld [vmem:[#allocation8 + $0x8] sm:$0xff]   ;;  %v935_v7 = vld [vmem:[#allocation8] sm:$0xff]   ;;  %s1386_s28 = sshll.u32 %s1178_s24, 6  ;;  %s342_s29 = scalar_lea.vmem [#allocation11], %s1365_s14 }
  0x61   : > { %800 = vmatpush3.bf16.msra.mxu0 %v930_v1  ;;  %808 = vmatpush3.bf16.msra.mxu1 %v931_v2  ;;  %s570_s7 = sshll.u32 %s342_s29, 4  ;;  %s335_s11 = scalar_lea.vmem [#allocation10], %s1365_s14  ;;  %s1396_s7 = int_to_ptr.vmem [resolvable:$true] %s570_s7 }
  0x62   : > { %801 = vmatprep.subr.bf16.mxu0 %v1194_v0  ;;  %809 = vmatprep.subr.bf16.mxu1 %v1194_v0  ;;  %s556_s9 = sshll.u32 %s335_s11, 4  ;;  %s1394_s20 = scalar_lea.hbm %s1511_s5, %s1386_s28  ;;  %s1404_s9 = int_to_ptr.vmem [resolvable:$true] %s556_s9 }
  0x63   : > { %s1402_s12 = scalar_lea.hbm %s1510_s4, %s1386_s28  ;;  %s1516_s16 = scalar_lea.vmem [#allocation13], %s1365_s14 }
  0x64   : > { %s1409_s2 = sshll.u32 %s1516_s16, 4  ;;  %s1411_s8 = scalar_lea.sflag [#allocation12], %s536_s1  ;;  %s585_s2 = int_to_ptr.vmem [resolvable:$true] %s1409_s2 }
  0x65   : > { %802 = vmatpush3.bf16.msra.mxu0 %v932_v3  ;;  %810 = vmatpush3.bf16.msra.mxu1 %v933_v4  ;;  %s1042_s13 = scalar_lea.vmem %s1396_s7, 64  ;;  %s1196_s15 = smov [#allocation11]  }
  0x66   : > { %815 = vmatprep.subr.bf16.mxu0 %v1194_v0  ;;  %p1043_p1 = scmp.ne.s32.totalorder %s1396_s7, %s1042_s13  ;;  %s1046_s24 = sshll.u32 %s1196_s15, 4  ;;  %s1047_s24 = int_to_ptr.vmem [resolvable:$false] %s1046_s24 }
  0x67   : > { %s1048_s27 = scalar_lea.vmem %s1047_s24, 128  ;;  %p1049_p2 = scmp.lt.s32.totalorder %s1396_s7, %s1047_s24 }
  0x68   : > { %804 = vmatmul.mubr.msk.bf16.vlgmr.msra.gmra.mxu0 %vm368_vm1, %v351_v5  ;;  %812 = vmatmul.mubr.msk.bf16.vlgmr.msra.gmra.mxu1 %vm368_vm1, %v351_v5  ;;  %p1044_p9 = pnand %p1043_p1, %p1332_p5  ;;  %p1050_p4 = scmp.lt.s32.totalorder %s1048_s27, %s1042_s13 }
  0x69   : > { %816 = vmatpush3.bf16.msra.mxu0 %v934_v6  ;;  %819 = vmatprep.mubr.msk.bf16.mxu0 %vm1195_vm0, %v1194_v0 }
  0x6a   : > { %817 = vmatprep.subr.bf16.mxu0 %v1194_v0  ;;  %p1045_p13 = pneg %p1044_p9  ;;  %p1051_p6 = por %p1050_p4, %p1049_p2 }
  0x6c   : > { %p1052_p12 = pnand %p1051_p6, %p1045_p13 }
  0x6d   : > { %818 = vmatpush3.bf16.msra.mxu0 %v935_v7 }
  0x70   : > { %820 = vmatmul.mubr.msk.bf16.vlgmr.msra.gmra.mxu0 %vm368_vm1, %v351_v5 }
 0x128   : > { %v406_v8 = vpop.f32.mrf.mxu0  ;;  %v465_v10 = vpop.f32.mrf.mxu1 }
 0x129   : > { %v412_v9 = vmul.f32 0.17677669, %v406_v8  ;;  %v471_v12 = vpack.c.bf16 %v465_v10, %v465_v10 }
 0x12a   : > { %v805_v11 = vpop.f32.mrf.mxu0  ;;  %v813_v14 = vpop.f32.mrf.mxu1 }
 0x12b   : > { %v413_v13 = vpack.c.bf16 %v412_v9, %v412_v9  ;;  %472 = vst [vmem:[%s342_s29] sm:$0xf] %v471_v12 }
 0x12c   : > { %v409_v15 = vpop.f32.mrf.mxu0  ;;  %v468_v16 = vpop.f32.mrf.mxu1 }
 0x12d   : > { %414 = vst [vmem:[%s335_s11] sm:$0xf] %v413_v13 }
 0x12e   : > { %1055 = shalt.err (!%p1052_p12)
}
 0x12f   : > { %s1056_s1 = scalar_lea.hbm %s1394_s20, 64  ;;  %s1060_s15 = scalar_lea.hbm %s1511_s5, 128 }
 0x130   : > { %p1057_p0 = scmp.ne.s32.totalorder %s1394_s20, %s1056_s1  ;;  %p1061_p8 = scmp.lt.s32.totalorder %s1394_s20, %s1511_s5 }
 0x131   : > { %p1062_p7 = scmp.lt.s32.totalorder %s1060_s15, %s1056_s1 }
 0x132   : > { %p1058_p3 = pnand %p1057_p0, %p1332_p5 }
 0x133   : > { %p1063_p11 = por %p1062_p7, %p1061_p8 }
 0x134   : > { %p1059_p10 = pneg %p1058_p3 }
 0x136   : > { %p1064_p1 = pnand %p1063_p11, %p1059_p10 }
 0x138   : > { %1067 = shalt.err (!%p1064_p1)
}
 0x139   : > { %838 = dma.vmem_to_hbm [thread:$0]  (%p1332_p5), %s1396_s7, 64, %s1394_s20, %s1411_s8   ;;  %v806_v17 = vpop.f32.mrf.mxu0 }
 0x13a   : > { %s532_s13 = scalar_lea.sflag [#allocation4], %s1362_s19  ;;  %s1068_s24 = scalar_lea.vmem %s1404_s9, 64 }
 0x13b   : > { %p1069_p9 = scmp.ne.s32.totalorder %s1404_s9, %s1068_s24  ;;  %s1197_s0 = smov [#allocation10]  }
 0x13c   : > { %s1072_s16 = sshll.u32 %s1197_s0, 4  ;;  %s1073_s16 = int_to_ptr.vmem [resolvable:$false] %s1072_s16 }
 0x13d   : > { %p1070_p13 = pnand %p1069_p9, %p1332_p5  ;;  %s1074_s27 = scalar_lea.vmem %s1073_s16, 128 }
 0x13e   : > { %p1075_p4 = scmp.lt.s32.totalorder %s1404_s9, %s1073_s16  ;;  %p1076_p6 = scmp.lt.s32.totalorder %s1074_s27, %s1068_s24 }
 0x13f   : > { %p1071_p2 = pneg %p1070_p13 }
 0x140   : > { %p1077_p12 = por %p1076_p6, %p1075_p4 }
 0x142   : > { %p1078_p0 = pnand %p1077_p12, %p1071_p2 }
 0x144   : > { %1081 = shalt.err (!%p1078_p0)
}
 0x145   : > { %s1082_s7 = scalar_lea.hbm %s1402_s12, 64  ;;  %s1086_s1 = scalar_lea.hbm %s1510_s4, 128 }
 0x146   : > { %p1083_p3 = scmp.ne.s32.totalorder %s1402_s12, %s1082_s7  ;;  %p1087_p7 = scmp.lt.s32.totalorder %s1402_s12, %s1510_s4 }
 0x147   : > { %p1088_p11 = scmp.lt.s32.totalorder %s1086_s1, %s1082_s7 }
 0x148   : > { %p1084_p10 = pnand %p1083_p3, %p1332_p5 }
 0x149   : > { %p1089_p1 = por %p1088_p11, %p1087_p7 }
 0x14a   : > { %p1085_p8 = pneg %p1084_p10 }
 0x14c   : > { %p1090_p9 = pnand %p1089_p1, %p1085_p8 }
 0x14e   : > { %1093 = shalt.err (!%p1090_p9)
}
 0x14f   : > { %837 = dma.vmem_to_hbm [thread:$0]  (%p1332_p5), %s1404_s9, 64, %s1402_s12, %s532_s13   ;;  %v814_v18 = vpop.f32.mrf.mxu1  ;;  %v523_v19 = vpop.f32.mrf.mxu0 }
 0x150   : > { %v529_v20 = vpack.c.bf16 %v523_v19, %v523_v19  ;;  %s1459_s0 = scalar_lea.hbm %s1512_s6, %s1386_s28  ;;  %s1535_s16 = scalar_lea.vmem [#allocation13], %s1365_s14 }
 0x151   : > { %v821_v21 = vpop.f32.mrf.mxu0  ;;  %s1094_s27 = scalar_lea.vmem %s585_s2, 64  ;;  %s1198_s7 = smov [#allocation13]  }
 0x152   : > { %530 = vst [vmem:[%s1535_s16] sm:$0xf] %v529_v20  ;;  %p1095_p13 = scmp.ne.s32.totalorder %s585_s2, %s1094_s27  ;;  %s1098_s9 = sshll.u32 %s1198_s7, 4  ;;  %s1099_s9 = int_to_ptr.vmem [resolvable:$false] %s1098_s9 }
 0x153   : > { %v526_v22 = vpop.f32.mrf.mxu0  ;;  %s1100_s12 = scalar_lea.vmem %s1099_s9, 128  ;;  %p1101_p6 = scmp.lt.s32.totalorder %s585_s2, %s1099_s9 }
 0x154   : > { %p1096_p2 = pnand %p1095_p13, %p1332_p5  ;;  %p1102_p12 = scmp.lt.s32.totalorder %s1100_s12, %s1094_s27 }
 0x156   : > { %p1097_p4 = pneg %p1096_p2  ;;  %p1103_p0 = por %p1102_p12, %p1101_p6 }
 0x158   : > { %p1104_p3 = pnand %p1103_p0, %p1097_p4 }
 0x15a   : > { %1107 = shalt.err (!%p1104_p3)
}
 0x15b   : > { %s1108_s14 = scalar_lea.hbm %s1459_s0, 64  ;;  %s1112_s19 = scalar_lea.hbm %s1512_s6, 128 }
 0x15c   : > { %p1109_p10 = scmp.ne.s32.totalorder %s1459_s0, %s1108_s14  ;;  %p1113_p11 = scmp.lt.s32.totalorder %s1459_s0, %s1512_s6 }
 0x15d   : > { %p1114_p1 = scmp.lt.s32.totalorder %s1112_s19, %s1108_s14 }
 0x15e   : > { %p1110_p8 = pnand %p1109_p10, %p1332_p5 }
 0x15f   : > { %p1115_p9 = por %p1114_p1, %p1113_p11 }
 0x160   : > { %p1111_p7 = pneg %p1110_p8 }
 0x162   : > { %p1116_p13 = pnand %p1115_p9, %p1111_p7 }
 0x164   : > { %1119 = shalt.err (!%p1116_p13)
}
 0x165   : > { %839 = dma.vmem_to_hbm [thread:$0]  (%p1332_p5), %s585_s2, 64, %s1459_s0, %s1411_s8   ;;  %v822_v23 = vpop.f32.mrf.mxu0 }
 0x166 PF: > { %s596_s29 = sand.u32 1, %s1166_s21   ;;  %p1536_p2 = scmp.ne.s32.totalorder %s1521_s30, 0 }
 0x167   : > { %p1537_p4 = scmp.ge.s32.totalorder %s1186_s26, 2  ;;  %s597_s11 = scalar_lea.sflag [#allocation4], %s596_s29 }
 0x169   : > { %p858_p6 = pnand %p1537_p4, %p1536_p2 }
 0x16b   : > { %p859_p12 = pneg %p858_p6 }
 0x16d   : > { %1157 = dma.done.wait (%p859_p12), %s597_s11, 64  }
 0x16e   : > { %1159 = vsyncadd (%p859_p12), %s597_s11, 4294967232  ;;  %s1538_s15 = sadd.s32 4294967294, %s1186_s26  }
 0x16f   : > { %s605_s24 = sand.u32 1, %s1538_s15  }
 0x170   : > { %s606_s10 = scalar_lea.sflag [#allocation12], %s605_s24 }
 0x171   : > { %1161 = dma.done.wait (%p859_p12), %s606_s10, 128  }
 0x172   : > { %1163 = vsyncadd (%p859_p12), %s606_s10, 4294967168  ;;  %s28_s26 = sadd.s32 1, %s1186_s26   ;;  %s1539_s21 = smov %s1170_s22 }
 0x173   : > { %p25_p5 = scmp.ge.s32.totalorder %s28_s26, 4   ;;  %s1540_s22 = smov %s1174_s23 }
 0x174   : > { %s1541_s23 = smov %s1344_s17  ;;  %s1542_s24 = smov %s1182_s25 }
 0x175   : > { %s1543_s25 = smov %s1545_s18  ;;  %27 = sbr.rel (!%p25_p5) target bundleno = 14 (0xe), region = 125 }
 0x17a   :  { %620 = vsyncpa [#allocation3], 1 }
 0x17b   :  { %622 = vsyncpa [#allocation3 + $0x1], 1 }
 0x17c   :  { %623 = vsyncpa [#allocation6], 1 }
 0x17d   :  { %624 = vsyncpa [#allocation9], 1 }
 0x17e   :  { %625 = vsyncpa [#allocation4], 1 }
 0x17f   :  { %627 = vsyncpa [#allocation4 + $0x1], 1 }
 0x180   :  { %628 = vsyncpa [#allocation12], 1 }
 0x181   :  { %630 = vsyncpa [#allocation12 + $0x1], 1 }

</bundles_post_ra>
